<compile_context>
chip_gen: v7x
topology: tpu7x:2x2x1
jax: 0.10.0
libtpu: 0.0.40
codegen_flags: <defaults>
</compile_context>

<pallas_src>
import jax
import jax.numpy as jnp
from jax import lax
from jax.experimental import pallas as pl
from jax.experimental.pallas import tpu as pltpu


_BIG_TILE = 512          # max rows per grid step at large batch (~2 MB f32 x tile)
_SINGLE_STEP_MAX = 256   # up to this many rows: run as one grid step


def _round_up(x, m):
    return ((x + m - 1) // m) * m


def _choose_tile(batch, row_align):
    """Pick (rows_per_step, padded_batch)."""
    b = _round_up(max(batch, row_align), row_align)
    if b <= _SINGLE_STEP_MAX:
        return b, b                              # one step: amortize fixed overhead
    steps = max(2, pl.cdiv(b, _BIG_TILE))        # >=2 parallel steps (v7x 2nd TC)
    tb = _round_up(pl.cdiv(b, steps), row_align) # balanced tiles, tb <= 512
    return tb, tb * steps


def dqn_kernel(x_ref, w1_ref, b1_ref, wa1_ref, ba1_ref, wa2_ref, ba2_ref, out_ref):
    x = x_ref[...]                                              # (tb, F)
    if x.dtype != jnp.bfloat16:
        x = x.astype(jnp.bfloat16)      # only on the f32-input path

    # fc1: w1 is bf16 in natural (48, F) layout; contract F on the MXU, f32 accum.
    h = lax.dot_general(x, w1_ref[...],
                        dimension_numbers=(((1,), (1,)), ((), ())),
                        preferred_element_type=jnp.float32)     # (tb, 48)
    h = jnp.maximum(h + b1_ref[...], 0.0)                       # relu(fc1), f32

    # al1: natural (12, 48) layout, f32 (tiny operand).
    a = lax.dot_general(h, wa1_ref[...],
                        dimension_numbers=(((1,), (1,)), ((), ())),
                        preferred_element_type=jnp.float32)     # (tb, 12)
    a = jnp.maximum(a + ba1_ref[...], 0.0)                      # relu(al1)

    # al2: stored as (12, N_pad), N_pad % 128 == 0 -> lane-dense output store.
    adv = jnp.dot(a, wa2_ref[...], preferred_element_type=jnp.float32)  # (tb, N_pad)
    out_ref[...] = (adv + ba2_ref[...]).astype(out_ref.dtype)


def dqn_forward(x_nchw, params, num_actions, out_dtype=jnp.float32):
    """x_nchw: (B, C, H, W) float32 or bfloat16. Returns advantage (B, num_actions)."""
    B = x_nchw.shape[0]
    feat = x_nchw.shape[1] * x_nchw.shape[2] * x_nchw.shape[3]
    x2d = x_nchw.reshape(B, feat)  # PyTorch x.view(-1, C*H*W)

    w1, b1, wa1, ba1, wa2, ba2 = params
    n_pad = wa2.shape[1]

    # Sublane alignment: 8 rows for 4-byte dtypes, 16 for 2-byte (bf16 packing).
    row_align = 8 if jnp.dtype(x2d.dtype).itemsize >= 4 else 16
    tb, B_pad = _choose_tile(B, row_align)
    if B_pad != B:
        x2d = jnp.pad(x2d, ((0, B_pad - B), (0, 0)))

    # Weights use a constant block index -> resident across grid steps.
    const = lambda a: pl.BlockSpec(a.shape, lambda i: (0,) * a.ndim)

    out = pl.pallas_call(
        dqn_kernel,
        out_shape=jax.ShapeDtypeStruct((B_pad, n_pad), out_dtype),
        grid=(B_pad // tb,),
        in_specs=[pl.BlockSpec((tb, feat), lambda i: (i, 0)),   # x tiles over batch
                  const(w1), const(b1),
                  const(wa1), const(ba1),
                  const(wa2), const(ba2)],
        out_specs=pl.BlockSpec((tb, n_pad), lambda i: (i, 0)),
        compiler_params=pltpu.CompilerParams(
            dimension_semantics=("parallel",)),  # megacore sharding when grid > 1
    )(x2d, w1, b1, wa1, ba1, wa2, ba2)

    return out[:B, :num_actions]


def init_params(key, feat, num_actions):
    """PyTorch nn.Linear-style init (U(-1/sqrt(fan_in), +)), stored kernel-friendly."""
    def linear(k, fan_in, fan_out):
        kw, kb = jax.random.split(k)
        bound = 1.0 / jnp.sqrt(fan_in)
        w = jax.random.uniform(kw, (fan_out, fan_in), jnp.float32, -bound, bound)  # (out, in)
        b = jax.random.uniform(kb, (1, fan_out), jnp.float32, -bound, bound)
        return w, b

    k1, k2, k3 = jax.random.split(key, 3)
    w1, b1 = linear(k1, feat, 48)             # fc1: (48, feat)
    wa1, ba1 = linear(k2, 48, 12)             # al1: (12, 48)
    wa2, ba2 = linear(k3, 12, num_actions)    # al2: (num_actions, 12)

    # al2 transposed + zero-padded to a 128-wide lane-dense slab.
    n_pad = pl.cdiv(num_actions, 128) * 128
    wa2_p = jnp.zeros((12, n_pad), jnp.float32).at[:, :num_actions].set(wa2.T)
    ba2_p = jnp.zeros((1, n_pad), jnp.float32).at[:, :num_actions].set(ba2)

    # fc1 weight dominates weight bytes -> bf16; biases/activations stay f32.
    return (w1.astype(jnp.bfloat16), b1, wa1, ba1, wa2_p, ba2_p)


def _reference(x2d, params, num_actions):
    """Plain-JAX reference with the same numerics (bf16 fc1 matmul, f32 accum)."""
    w1, b1, wa1, ba1, wa2, ba2 = params
    h = lax.dot_general(x2d.astype(jnp.bfloat16), w1,
                        dimension_numbers=(((1,), (1,)), ((), ())),
                        preferred_element_type=jnp.float32)
    h = jnp.maximum(h + b1, 0.0)
    a = jnp.maximum(h @ wa1.T + ba1, 0.0)
    return (a @ wa2 + ba2)[:, :num_actions]


if __name__ == "__main__":
    key = jax.random.PRNGKey(0)
    C, H, W = 4, 16, 16                  # frame_shape = (4, 16, 16)
    num_actions = 6
    feat = C * H * W

    kx1, kx2, kp = jax.random.split(key, 3)
    params = init_params(kp, feat, num_actions)

    # --- small f32 batch (matches the PyTorch spec's default usage) ---------
    B = 2
    x = jax.random.normal(kx1, (B, C, H, W), jnp.float32)
    out = dqn_forward(x, params, num_actions)
    jax.block_until_ready(out)
    ref = _reference(x.reshape(B, feat), params, num_actions)
    assert out.shape == (B, num_actions)
    assert jnp.allclose(out, ref, atol=1e-2, rtol=1e-2)

    # --- mid-size bf16 batch: exercises the no-cast fast path + 1-step tiling
    B2 = 72
    x2 = jax.random.normal(kx2, (B2, C, H, W), jnp.float32).astype(jnp.bfloat16)
    out2 = dqn_forward(x2, params, num_actions)
    jax.block_until_ready(out2)
    ref2 = _reference(x2.reshape(B2, feat), params, num_actions)
    assert out2.shape == (B2, num_actions)
    assert jnp.allclose(out2, ref2, atol=1e-2, rtol=1e-2)

    print("KERNEL_OK")
</pallas_src>

<mosaic_0001>
module attributes {stable_mosaic.version = 11 : i64} {
  func.func @dqn_kernel(%arg0: i32, %arg1: memref<8x1024xf32, #tpu.memory_space<vmem>>, %arg2: memref<48x1024xbf16, #tpu.memory_space<vmem>>, %arg3: memref<1x48xf32, #tpu.memory_space<vmem>>, %arg4: memref<12x48xf32, #tpu.memory_space<vmem>>, %arg5: memref<1x12xf32, #tpu.memory_space<vmem>>, %arg6: memref<12x128xf32, #tpu.memory_space<vmem>>, %arg7: memref<1x128xf32, #tpu.memory_space<vmem>>, %arg8: memref<8x128xf32, #tpu.memory_space<vmem>>) attributes {dimension_semantics = [#tpu.dimension_semantics<parallel>], iteration_bounds = array<i64: 1>, scalar_prefetch = 0 : i64, scratch_operands = 0 : i64, tpu.core_type = #tpu.core_type<tc>, window_params = [{transform_indices = @transform_0, window_bounds = array<i64: 8, 1024>}, {pipeline_mode = #tpu.pipeline_mode<synchronous>, transform_indices = @transform_1, window_bounds = array<i64: 48, 1024>}, {pipeline_mode = #tpu.pipeline_mode<synchronous>, transform_indices = @transform_2, window_bounds = array<i64: 1, 48>}, {pipeline_mode = #tpu.pipeline_mode<synchronous>, transform_indices = @transform_3, window_bounds = array<i64: 12, 48>}, {pipeline_mode = #tpu.pipeline_mode<synchronous>, transform_indices = @transform_4, window_bounds = array<i64: 1, 12>}, {pipeline_mode = #tpu.pipeline_mode<synchronous>, transform_indices = @transform_5, window_bounds = array<i64: 12, 128>}, {pipeline_mode = #tpu.pipeline_mode<synchronous>, transform_indices = @transform_6, window_bounds = array<i64: 1, 128>}, {transform_indices = @transform_7, window_bounds = array<i64: 8, 128>}]} {
    %c0 = arith.constant 0 : index
    %c0_0 = arith.constant 0 : index
    %0 = vector.load %arg1[%c0, %c0_0] : memref<8x1024xf32, #tpu.memory_space<vmem>>, vector<8x1024xf32>
    %1 = arith.truncf %0 : vector<8x1024xf32> to vector<8x1024xbf16>
    %c0_1 = arith.constant 0 : index
    %c0_2 = arith.constant 0 : index
    %2 = vector.load %arg2[%c0_1, %c0_2] : memref<48x1024xbf16, #tpu.memory_space<vmem>>, vector<48x1024xbf16>
    %cst = arith.constant dense<0.000000e+00> : vector<8x48xf32>
    %3 = tpu.matmul %1, %2, %cst {dimension_numbers = #tpu.dot_dimension_numbers<[1], [1], [0], [0], [0, 0, 1, 0], [], []>} : vector<8x1024xbf16>, vector<48x1024xbf16>, vector<8x48xf32> -> vector<8x48xf32>
    %c0_3 = arith.constant 0 : index
    %c0_4 = arith.constant 0 : index
    %4 = vector.load %arg3[%c0_3, %c0_4] : memref<1x48xf32, #tpu.memory_space<vmem>>, vector<1x48xf32>
    %5 = vector.broadcast %4 : vector<1x48xf32> to vector<8x48xf32>
    %6 = arith.addf %3, %5 : vector<8x48xf32>
    %cst_5 = arith.constant 0.000000e+00 : f32
    %7 = vector.broadcast %cst_5 : f32 to vector<8x48xf32>
    %8 = arith.maximumf %6, %7 : vector<8x48xf32>
    %c0_6 = arith.constant 0 : index
    %c0_7 = arith.constant 0 : index
    %9 = vector.load %arg4[%c0_6, %c0_7] : memref<12x48xf32, #tpu.memory_space<vmem>>, vector<12x48xf32>
    %cst_8 = arith.constant dense<0.000000e+00> : vector<8x12xf32>
    %10 = tpu.matmul %8, %9, %cst_8 {dimension_numbers = #tpu.dot_dimension_numbers<[1], [1], [0], [0], [0, 0, 1, 0], [], []>} : vector<8x48xf32>, vector<12x48xf32>, vector<8x12xf32> -> vector<8x12xf32>
    %c0_9 = arith.constant 0 : index
    %c0_10 = arith.constant 0 : index
    %11 = vector.load %arg5[%c0_9, %c0_10] : memref<1x12xf32, #tpu.memory_space<vmem>>, vector<1x12xf32>
    %12 = vector.broadcast %11 : vector<1x12xf32> to vector<8x12xf32>
    %13 = arith.addf %10, %12 : vector<8x12xf32>
    %cst_11 = arith.constant 0.000000e+00 : f32
    %14 = vector.broadcast %cst_11 : f32 to vector<8x12xf32>
    %15 = arith.maximumf %13, %14 : vector<8x12xf32>
    %c0_12 = arith.constant 0 : index
    %c0_13 = arith.constant 0 : index
    %16 = vector.load %arg6[%c0_12, %c0_13] : memref<12x128xf32, #tpu.memory_space<vmem>>, vector<12x128xf32>
    %cst_14 = arith.constant dense<0.000000e+00> : vector<8x128xf32>
    %17 = tpu.matmul %15, %16, %cst_14 {dimension_numbers = #tpu.dot_dimension_numbers<[1], [0], [0], [1], [0, 0, 1, 1], [], []>} : vector<8x12xf32>, vector<12x128xf32>, vector<8x128xf32> -> vector<8x128xf32>
    %c0_15 = arith.constant 0 : index
    %c0_16 = arith.constant 0 : index
    %18 = vector.load %arg7[%c0_15, %c0_16] : memref<1x128xf32, #tpu.memory_space<vmem>>, vector<1x128xf32>
    %19 = vector.broadcast %18 : vector<1x128xf32> to vector<8x128xf32>
    %20 = arith.addf %17, %19 : vector<8x128xf32>
    %c0_17 = arith.constant 0 : index
    %c0_18 = arith.constant 0 : index
    %21 = vector.load %arg8[%c0_17, %c0_18] : memref<8x128xf32, #tpu.memory_space<vmem>>, vector<8x128xf32>
    tpu.vector_store %arg8[%c0_17, %c0_18], %20 {strides = array<i32>} : memref<8x128xf32, #tpu.memory_space<vmem>>, vector<8x128xf32>,
    return
  }
  func.func @transform_0(%arg0: i32) -> (i32, i32) {
    %c0_i32 = arith.constant 0 : i32
    %c0_i32_0 = arith.constant 0 : i32
    return %arg0, %c0_i32 : i32, i32
  }
  func.func @transform_1(%arg0: i32) -> (i32, i32) {
    %c0_i32 = arith.constant 0 : i32
    %c0_i32_0 = arith.constant 0 : i32
    %c0_i32_1 = arith.constant 0 : i32
    return %c0_i32, %c0_i32_0 : i32, i32
  }
  func.func @transform_2(%arg0: i32) -> (i32, i32) {
    %c0_i32 = arith.constant 0 : i32
    %c0_i32_0 = arith.constant 0 : i32
    %c0_i32_1 = arith.constant 0 : i32
    return %c0_i32, %c0_i32_0 : i32, i32
  }
  func.func @transform_3(%arg0: i32) -> (i32, i32) {
    %c0_i32 = arith.constant 0 : i32
    %c0_i32_0 = arith.constant 0 : i32
    %c0_i32_1 = arith.constant 0 : i32
    return %c0_i32, %c0_i32_0 : i32, i32
  }
  func.func @transform_4(%arg0: i32) -> (i32, i32) {
    %c0_i32 = arith.constant 0 : i32
    %c0_i32_0 = arith.constant 0 : i32
    %c0_i32_1 = arith.constant 0 : i32
    return %c0_i32, %c0_i32_0 : i32, i32
  }
  func.func @transform_5(%arg0: i32) -> (i32, i32) {
    %c0_i32 = arith.constant 0 : i32
    %c0_i32_0 = arith.constant 0 : i32
    %c0_i32_1 = arith.constant 0 : i32
    return %c0_i32, %c0_i32_0 : i32, i32
  }
  func.func @transform_6(%arg0: i32) -> (i32, i32) {
    %c0_i32 = arith.constant 0 : i32
    %c0_i32_0 = arith.constant 0 : i32
    %c0_i32_1 = arith.constant 0 : i32
    return %c0_i32, %c0_i32_0 : i32, i32
  }
  func.func @transform_7(%arg0: i32) -> (i32, i32) {
    %c0_i32 = arith.constant 0 : i32
    %c0_i32_0 = arith.constant 0 : i32
    return %arg0, %c0_i32 : i32, i32
  }
}

</mosaic_0001>

<bundles_post_ra>
// kernel: tpu_custom_call.1
= control target key start
LH: loop header
LB: loop body
LE: loop exit
PB: predicated region body
PF: predicated region fallthrough
CT: control target
= control target key end

     0   :  { %12 = vsyncpa [#allocation3], 0  ;;  %s883_s0 = inlined_call_operand.hbm [shape: f32[8,1024], index: 0, kind: input, shape index: {}]   ;;  %s884_s1 = inlined_call_operand.hbm [shape: bf16[48,1024], index: 1, kind: input, shape index: {}]   ;;  %s885_s2 = inlined_call_operand.vmem [shape: f32[1,48], index: 2, kind: input, shape index: {}]   ;;  %s886_s3 = inlined_call_operand.hbm [shape: f32[12,48], index: 3, kind: input, shape index: {}]   ;;  %s887_s4 = inlined_call_operand.vmem [shape: f32[1,12], index: 4, kind: input, shape index: {}]   ;;  %s888_s5 = inlined_call_operand.vmem [shape: f32[12,128], index: 5, kind: input, shape index: {}]   ;;  %s889_s6 = inlined_call_operand.vmem [shape: f32[1,128], index: 6, kind: input, shape index: {}]   ;;  %s890_s7 = inlined_call_operand.hbm [shape: f32[8,128], index: 7, kind: output, shape index: {}]  }
   0x1   :  { %13 = vsyncpa [#allocation6], 0 }
   0x2   :  { %14 = vsyncpa [#allocation4], 0  ;;  %s765_s24 = smov [#allocation5]   ;;  %s671_s28 = scalar_lea.hbm %s884_s1, 3072 }
   0x3   :  { %s30_s25 = sshll.u32 %s765_s24, 4  ;;  %p672_p0 = scmp.ne.s32.totalorder %s884_s1, %s671_s28  ;;  %s31_s25 = int_to_ptr.vmem [resolvable:$true] %s30_s25 }
   0x4   :  { %p675_p1 = scmp.lt.u32.totalorder %s671_s28, %s884_s1 }
   0x6   :  { %p677_p2 = pnand %p675_p1, %p672_p0 }
   0x8   :  { %680 = shalt.err (!%p677_p2)
}
   0x9   :  { %s681_s10 = scalar_lea.vmem %s31_s25, 3072  ;;  %p686_p4 = scmp.lt.s32.totalorder %s31_s25, %s31_s25 }
   0xa   :  { %p682_p3 = scmp.ne.s32.totalorder %s31_s25, %s681_s10  ;;  %p687_p5 = scmp.lt.s32.totalorder %s681_s10, %s681_s10 }
   0xc   :  { %p688_p6 = por %p687_p5, %p686_p4 }
   0xe   :  { %p689_p7 = pnand %p688_p6, %p682_p3 }
  0x10   :  { %692 = shalt.err (!%p689_p7)
}
  0x11   :  { %s766_s11 = smov 512   ;;  %s767_s12 = smov 32  }
  0x12   :  { %36 = dma.hbm_to_vmem [thread:$0]  %s884_s1, 3072, %s31_s25, [#allocation6], %s766_s11, %s766_s11, %s767_s12  }
  0x13   :  { %s768_s15 = smov [#allocation2]   ;;  %s769_s17 = smov [#allocation7]  }
  0x14   :  { %s21_s16 = sshll.u32 %s768_s15, 4  ;;  %s44_s18 = sshll.u32 %s769_s17, 4  ;;  %s22_s16 = int_to_ptr.vmem [resolvable:$true] %s21_s16  ;;  %s45_s18 = int_to_ptr.vmem [resolvable:$true] %s44_s18 }
  0x15   :  { %s693_s21 = scalar_lea.hbm %s883_s0, 1024 }
  0x16   :  { %p694_p8 = scmp.ne.s32.totalorder %s883_s0, %s693_s21  ;;  %p697_p9 = scmp.lt.u32.totalorder %s693_s21, %s883_s0 }
  0x18   :  { %p699_p10 = pnand %p697_p9, %p694_p8 }
  0x1a   :  { %702 = shalt.err (!%p699_p10)
}
  0x1b   :  { %s703_s1 = scalar_lea.vmem %s22_s16, 1024  ;;  %p708_p12 = scmp.lt.s32.totalorder %s22_s16, %s22_s16 }
  0x1c   :  { %p704_p11 = scmp.ne.s32.totalorder %s22_s16, %s703_s1  ;;  %p709_p13 = scmp.lt.s32.totalorder %s703_s1, %s703_s1 }
  0x1e   :  { %p710_p0 = por %p709_p13, %p708_p12 }
  0x20   :  { %p711_p1 = pnand %p710_p0, %p704_p11 }
  0x22   :  { %714 = shalt.err (!%p711_p1)
}
  0x23   :  { %24 = dma.hbm_to_vmem [thread:$0]  %s883_s0, 1024, %s22_s16, [#allocation3]  }
  0x24   :  { %s715_s30 = scalar_lea.hbm %s886_s3, 256 }
  0x25   :  { %p716_p2 = scmp.ne.s32.totalorder %s886_s3, %s715_s30  ;;  %p719_p3 = scmp.lt.u32.totalorder %s715_s30, %s886_s3 }
  0x27   :  { %p721_p4 = pnand %p719_p3, %p716_p2 }
  0x29   :  { %724 = shalt.err (!%p721_p4)
}
  0x2a   :  { %s725_s12 = scalar_lea.vmem %s45_s18, 256  ;;  %p730_p6 = scmp.lt.s32.totalorder %s45_s18, %s45_s18 }
  0x2b   :  { %p726_p5 = scmp.ne.s32.totalorder %s45_s18, %s725_s12  ;;  %p731_p7 = scmp.lt.s32.totalorder %s725_s12, %s725_s12 }
  0x2d   :  { %p732_p8 = por %p731_p7, %p730_p6 }
  0x2f   :  { %p733_p9 = pnand %p732_p8, %p726_p5 }
  0x31   :  { %736 = shalt.err (!%p733_p9)
}
  0x32   :  { %s770_s0 = smov 128   ;;  %s771_s13 = smov 8  }
  0x33   :  { %50 = dma.hbm_to_vmem [thread:$0]  %s886_s3, 256, %s45_s18, [#allocation6], %s770_s0, %s770_s0, %s771_s13  }
  0x34   :  { %759 = dma.done.wait [#allocation3], 1024  }
  0x35   :  { %760 = vsyncadd [#allocation3], 4294966272 }
  0x36   :  { %761 = dma.done.wait [#allocation6], 3328  }
  0x37   :  { %762 = vsyncadd [#allocation6], 4294963968  ;;  %v83_v0 = vld [vmem:[#allocation5] sm:$0xff]  ;;  %v85_v2 = vld [vmem:[#allocation5 + $0x10] sm:$0xff]  ;;  %v772_v62 = vmov 0.0|0.0   ;;  %vm404_vm0 = vcmask 392192  }
  0x38   :  { %v87_v1 = vld [vmem:[#allocation5 + $0x20] sm:$0xff]  ;;  %v89_v4 = vld [vmem:[#allocation5 + $0x30] sm:$0xff]  ;;  %v68_v14 = vld [vmem:[#allocation2 + $0x8] sm:$0xff]  ;;  %vm773_vm2 = vmmov 0   ;;  %vm498_vm3 = vcmask 1043456   ;;  %vm775_vm4 = vmmov 1  }
  0x39   :  { %v591_v3 = vcombine.high %v83_v0, %v87_v1  ;;  %v590_v5 = vcombine.low %v83_v0, %v87_v1  ;;  %v91_v6 = vld [vmem:[#allocation5 + $0x40] sm:$0xff]  ;;  %v595_v8 = vcombine.high %v85_v2, %v89_v4  ;;  %v594_v9 = vcombine.low %v85_v2, %v89_v4  ;;  %v93_v11 = vld [vmem:[#allocation5 + $0x50] sm:$0xff]  ;;  %v72_v16 = vld [vmem:[#allocation2 + $0x28] sm:$0xff]  ;;  %s776_s23 = smov [#allocation8]  }
  0x3a   :  { %v95_v7 = vld [vmem:[#allocation5 + $0x60] sm:$0xff]  ;;  %v97_v12 = vld [vmem:[#allocation5 + $0x70] sm:$0xff]  ;;  %v76_v15 = vpack.c.bf16 %v68_v14, %v68_v14  ;;  %v80_v19 = vpack.c.bf16 %v72_v16, %v72_v16  ;;  %v84_v26 = vld [vmem:[#allocation5 + $0x8] sm:$0xff]  ;;  %v774_v4 = vmov 0.0   ;;  %vm494_vm6 = vcmask 97280   ;;  %s579_s24 = sshll.u32 %s776_s23, 4  ;;  %s580_s24 = int_to_ptr.vmem [resolvable:$true] %s579_s24 }
  0x3b   :  { %v599_v10 = vcombine.high %v91_v6, %v95_v7  ;;  %234 = vmatprep.subr.bf16.mxu1 %v591_v3  ;;  %v603_v13 = vcombine.high %v93_v11, %v97_v12  ;;  %314 = vmatprep.subr.bf16.mxu0 %v595_v8  ;;  %v99_v17 = vld [vmem:[#allocation5 + $0x80] sm:$0xff]  ;;  %v101_v20 = vld [vmem:[#allocation5 + $0x90] sm:$0xff]  ;;  %v598_v22 = vcombine.low %v91_v6, %v95_v7  ;;  %v88_v27 = vld [vmem:[#allocation5 + $0x28] sm:$0xff]  ;;  %s737_s26 = scalar_lea.vmem %s580_s24, 128  ;;  %p742_p11 = scmp.lt.s32.totalorder %s580_s24, %s580_s24 }
  0x3c   :  { %235 = vmatpush1.bf16.xpose.msra.mxu1 %v590_v5  ;;  %315 = vmatpush1.bf16.xpose.msra.mxu0 %v594_v9  ;;  %v103_v18 = vld [vmem:[#allocation5 + $0xa0] sm:$0xff]  ;;  %v105_v21 = vld [vmem:[#allocation5 + $0xb0] sm:$0xff]  ;;  %v602_v23 = vcombine.low %v93_v11, %v97_v12  ;;  %v86_v28 = vld [vmem:[#allocation5 + $0x18] sm:$0xff]  ;;  %v593_v32 = vcombine.high %v84_v26, %v88_v27  ;;  %v592_v42 = vcombine.low %v84_v26, %v88_v27  ;;  %p738_p10 = scmp.ne.s32.totalorder %s580_s24, %s737_s26  ;;  %p743_p12 = scmp.lt.s32.totalorder %s737_s26, %s737_s26 }
  0x3d   :  { %236 = vmatprep.subr.bf16.mxu1 %v599_v10  ;;  %316 = vmatprep.subr.bf16.mxu0 %v603_v13  ;;  %v607_v24 = vcombine.high %v99_v17, %v103_v18  ;;  %v611_v25 = vcombine.high %v101_v20, %v105_v21  ;;  %v90_v29 = vld [vmem:[#allocation5 + $0x38] sm:$0xff]  ;;  %v606_v30 = vcombine.low %v99_v17, %v103_v18  ;;  %v67_v34 = vld [vmem:[#allocation2] sm:$0xff]  ;;  %v92_v36 = vld [vmem:[#allocation5 + $0x48] sm:$0xff] }
  0x3e   :  { %266 = vmatprep.mubr.bf16.mxu1 %v76_v15  ;;  %346 = vmatprep.mubr.bf16.mxu0 %v80_v19  ;;  %v610_v31 = vcombine.low %v101_v20, %v105_v21  ;;  %v597_v33 = vcombine.high %v86_v28, %v90_v29  ;;  %v71_v35 = vld [vmem:[#allocation2 + $0x20] sm:$0xff]  ;;  %v96_v37 = vld [vmem:[#allocation5 + $0x68] sm:$0xff]  ;;  %v75_v38 = vpack.c.bf16 %v67_v34, %v67_v34  ;;  %v94_v39 = vld [vmem:[#allocation5 + $0x58] sm:$0xff]  ;;  %p744_p13 = por %p743_p12, %p742_p11 }
  0x3f   :  { %v98_v40 = vld [vmem:[#allocation5 + $0x78] sm:$0xff]  ;;  %v79_v43 = vpack.c.bf16 %v71_v35, %v71_v35  ;;  %v596_v45 = vcombine.low %v86_v28, %v90_v29  ;;  %v601_v46 = vcombine.high %v92_v36, %v96_v37  ;;  %v100_v50 = vld [vmem:[#allocation5 + $0x88] sm:$0xff]  ;;  %v600_v54 = vcombine.low %v92_v36, %v96_v37  ;;  %v69_v60 = vld [vmem:[#allocation2 + $0x10] sm:$0xff] }
  0x40   :  { %v70_v41 = vld [vmem:[#allocation2 + $0x18] sm:$0xff]  ;;  %v605_v47 = vcombine.high %v94_v39, %v98_v40  ;;  %v104_v51 = vld [vmem:[#allocation5 + $0xa8] sm:$0xff]  ;;  %v604_v55 = vcombine.low %v94_v39, %v98_v40  ;;  %v73_v61 = vld [vmem:[#allocation2 + $0x30] sm:$0xff]  ;;  %v77_v1 = vpack.c.bf16 %v69_v60, %v69_v60  ;;  %p745_p0 = pnand %p744_p13, %p738_p10 }
  0x41   :  { %v74_v44 = vld [vmem:[#allocation2 + $0x38] sm:$0xff]  ;;  %v78_v48 = vpack.c.bf16 %v70_v41, %v70_v41  ;;  %v609_v56 = vcombine.high %v100_v50, %v104_v51  ;;  %v608_v58 = vcombine.low %v100_v50, %v104_v51  ;;  %v395_v63 = vld [vmem:[#allocation7] sm:$0xff]  ;;  %v396_v0 = vld [vmem:[#allocation7 + $0x8] sm:$0xf]  ;;  %v81_v2 = vpack.c.bf16 %v73_v61, %v73_v61 }
  0x42   :  { %v82_v49 = vpack.c.bf16 %v74_v44, %v74_v44  ;;  %v102_v52 = vld [vmem:[#allocation5 + $0x98] sm:$0xff]  ;;  %v642_v3 = vpack.c.bf16 %v396_v0, %v395_v63  ;;  %vm643_vm1 = vmpackc.low %vm404_vm0, %vm404_vm0  ;;  %v485_v5 = vld [vmem:[%s888_s5] sm:$0xff] }
  0x43   :  { %v106_v53 = vld [vmem:[#allocation5 + $0xb8] sm:$0xff]  ;;  %v486_v6 = vld [vmem:[%s888_s5 + $0x8] sm:$0xf]  ;;  %vm647_vm5 = vmpackc.low %vm498_vm3, %vm775_vm4 }
  0x44   :  { %237 = vmatpush1.bf16.xpose.msra.mxu1 %v598_v22  ;;  %317 = vmatpush1.bf16.xpose.msra.mxu0 %v602_v23  ;;  %v613_v57 = vcombine.high %v102_v52, %v106_v53  ;;  %v612_v59 = vcombine.low %v102_v52, %v106_v53  ;;  %v646_v7 = vpack.c.bf16 %v486_v6, %v485_v5  ;;  %v589_v8 = vld [vmem:[%s885_s2] ss:$0 sm:$0xff] }
  0x45   :  { %238 = vmatprep.subr.bf16.mxu1 %v607_v24  ;;  %318 = vmatprep.subr.bf16.mxu0 %v611_v25  ;;  %v614_v20 = vld [vmem:[%s887_s4] ss:$0 sm:$0xff] }
  0x46   :  { %v618_v25 = vld [vmem:[%s889_s6] ss:$0 sm:$0xff] }
  0x4c   :  { %239 = vmatpush1.bf16.xpose.msra.mxu1 %v606_v30  ;;  %319 = vmatpush1.bf16.xpose.msra.mxu0 %v610_v31 }
  0x4d   :  { %274 = vmatprep.subr.bf16.mxu1 %v593_v32  ;;  %354 = vmatprep.subr.bf16.mxu0 %v597_v33 }
  0x53   :  { %267 = vmatmul.mubr.bf16.vlgmr.msra.gmra.mrb[0].mxu1 %v75_v38  ;;  %347 = vmatmul.mubr.bf16.vlgmr.msra.gmra.mrb[0].mxu0 %v79_v43 }
  0x54   :  { %275 = vmatpush1.bf16.xpose.msra.mxu1 %v592_v42  ;;  %355 = vmatpush1.bf16.xpose.msra.mxu0 %v596_v45 }
  0x55   :  { %276 = vmatprep.subr.bf16.mxu1 %v601_v46  ;;  %356 = vmatprep.subr.bf16.mxu0 %v605_v47 }
  0x56   :  { %306 = vmatprep.mubr.bf16.mxu1 %v78_v48  ;;  %386 = vmatprep.mubr.bf16.mxu0 %v82_v49 }
  0x5c   :  { %277 = vmatpush1.bf16.xpose.msra.mxu1 %v600_v54  ;;  %357 = vmatpush1.bf16.xpose.msra.mxu0 %v604_v55 }
  0x5d   :  { %278 = vmatprep.subr.bf16.mxu1 %v609_v56  ;;  %358 = vmatprep.subr.bf16.mxu0 %v613_v57 }
  0x64   :  { %279 = vmatpush1.bf16.xpose.msra.mxu1 %v608_v58  ;;  %359 = vmatpush1.bf16.xpose.msra.mxu0 %v612_v59 }
  0x65   :  { %645 = vmatprep.subr.bf16.mxu1 %v772_v62  ;;  %641 = vmatprep.subr.bf16.mxu0 %v772_v62 }
  0x6b   :  { %307 = vmatmul.mubr.bf16.vlgmr.msra.gmra.mrb[0].mxu1 %v77_v1  ;;  %387 = vmatmul.mubr.bf16.vlgmr.msra.gmra.mrb[0].mxu0 %v81_v2 }
  0x6c   :  { %644 = vmatpush3.bf16.xpose.msk.msra.mxu0 %vm643_vm1, %v642_v3  ;;  %631 = vmatprep.mubr.msk.f32.mxu0 %vm773_vm2, %v774_v4 }
  0x6d   :  { %638 = vmatprep.mubr.msk.f32.mxu1 %vm773_vm2, %v774_v4  ;;  %648 = vmatpush3.bf16.msk.msra.mxu1 %vm647_vm5, %v646_v7 }
 0x13e   :  { %v308_v9 = vpop.f32.mrb[0].mxu1  ;;  %v388_v11 = vpop.f32.mrb[0].mxu0 }
 0x13f   :  { %v649_v10 = vadd.f32 %v589_v8, %v308_v9  ;;  %v310_v12 = vpop.f32.mrb[1].mxu1  ;;  %v390_v13 = vpop.f32.mrb[1].mxu0 }
 0x140   :  { %v311_v14 = vpop.f32.mrb[2].mxu1  ;;  %v391_v16 = vpop.f32.mrb[2].mxu0 }
 0x141   :  { %v650_v15 = vadd.f32 %v649_v10, %v388_v11  ;;  %v312_v17 = vpop.f32.mrb[3].mxu1  ;;  %v392_v18 = vpop.f32.mrb[3].mxu0 }
 0x143   :  { %v394_v19 = vmax.f32 %v650_v15, 0.0 }
 0x145   :  { %632 = vmatmul.mubr.msk.f32.vlgmr.msra.gmra.mrb[4].mxu0 %vm404_vm0, %v394_v19 }
 0x218   :  { %v480_v21 = vpop.f32.mrb[4].mxu0 }
 0x219   :  { %v481_v22 = vadd.f32 %v614_v20, %v480_v21  ;;  %v633_v23 = vpop.f32.mrb[5].mxu0 }
 0x21b   :  { %v484_v24 = vmax.f32 %v481_v22, 0.0 }
 0x21d   :  { %639 = vmatmul.mubr.msk.f32.vlgmr.msra.gmra.mrb[4].mxu1 %vm494_vm6, %v484_v24 }
 0x2f0   :  { %v568_v26 = vpop.f32.mrb[4].mxu1 }
 0x2f1   :  { %v569_v27 = vadd.f32 %v618_v25, %v568_v26  ;;  %v640_v28 = vpop.f32.mrb[5].mxu1 }
 0x2f3   :  { %572 = vst [vmem:[#allocation8] sm:$0xff] %v569_v27 }
 0x2f4   :  { %748 = shalt.err (!%p745_p0)
}
 0x2f5   :  { %s749_s25 = scalar_lea.hbm %s890_s7, 128 }
 0x2f6   :  { %p750_p1 = scmp.ne.s32.totalorder %s890_s7, %s749_s25  ;;  %p753_p2 = scmp.lt.u32.totalorder %s749_s25, %s890_s7 }
 0x2f8   :  { %p755_p3 = pnand %p753_p2, %p750_p1 }
 0x2fa   :  { %758 = shalt.err (!%p755_p3)
}
 0x2fb   :  { %582 = dma.vmem_to_hbm [thread:$0]  %s580_s24, 128, %s890_s7, [#allocation4]  }
 0x2fc   :  { %763 = dma.done.wait [#allocation4], 128  }
 0x2fd   :  { %764 = vsyncadd [#allocation4], 4294967168 }
 0x2fe   :  { %586 = vsyncpa [#allocation3], 1 }
 0x2ff   :  { %587 = vsyncpa [#allocation6], 1 }
 0x300   :  { %588 = vsyncpa [#allocation4], 1 }

</bundles_post_ra>
